<compile_context>
chip_gen: v5e
topology: v5e:2x2
jax: 0.10.0
libtpu: 0.0.40
codegen_flags: <defaults>
</compile_context>

<pallas_src>
import math

import jax
import jax.numpy as jnp
from jax import lax
from jax.experimental import pallas as pl
from jax.experimental.pallas import tpu as pltpu

_LANES = 128
_SUBLANES = 8
_BLOCK_BYTES = 2 * 1024 * 1024  # per data-block budget (safe on v5e/v6e/v7x)
_INT_SENTINEL = 2**31 - 1


def _round_up(a: int, m: int) -> int:
    return (a + m - 1) // m * m


def _lowest_py(dtype):
    dtype = jnp.dtype(dtype)
    if jnp.issubdtype(dtype, jnp.floating):
        return float("-inf")
    return int(jnp.iinfo(dtype).min)


# ----------------------------------------------------------------------------
# One-time probe: find a column -> row relayout formulation that lowers.
# Used to make the last-axis output lane-dense; falls back to column output.
# ----------------------------------------------------------------------------
_COL2ROW_FORM = "unchecked"


def _col_to_row_form():
    global _COL2ROW_FORM
    if _COL2ROW_FORM != "unchecked":
        return _COL2ROW_FORM

    n = 256
    x = (jnp.arange(n, dtype=jnp.int32)[:, None] * 8
         + jnp.arange(8, dtype=jnp.int32)[None, :])
    expect = jnp.arange(n, dtype=jnp.int32) * 8
    forms = (
        lambda c: jnp.transpose(c),
        lambda c: jnp.reshape(c, (1, c.shape[0])),
        lambda c: pltpu.einshape("ab->ba", c),
    )

    chosen = None
    for f in forms:
        def probe(x_ref, o_ref, _f=f):
            col = jnp.min(x_ref[...], axis=1, keepdims=True)   # (n, 1)
            o_ref[...] = _f(col)                                # (1, n)

        try:
            r = pl.pallas_call(
                probe, out_shape=jax.ShapeDtypeStruct((1, n), jnp.int32))(x)
            r = jax.block_until_ready(r)
            if bool(jnp.array_equal(r[0], expect)):
                chosen = f
                break
        except Exception:
            continue
    _COL2ROW_FORM = chosen
    return chosen


# ----------------------------------------------------------------------------
# dim=None : global argmax over the flattened tensor
# ----------------------------------------------------------------------------
def _argmax_flat(x: jax.Array) -> jax.Array:
    n = x.size
    dtype = x.dtype
    lowest = _lowest_py(dtype)
    item = dtype.itemsize

    rows = pl.cdiv(max(n, 1), _LANES)
    max_rows = max(_SUBLANES,
                   (_BLOCK_BYTES // (item * _LANES)) // _SUBLANES * _SUBLANES)
    if rows <= max_rows:
        tile_r = _round_up(rows, _SUBLANES)
        steps = 1
    else:
        tile_r = max_rows
        steps = pl.cdiv(rows, tile_r)

    n_outer = 2 if steps >= 2 else 1          # v7x: one independent chunk per TC
    n_inner = pl.cdiv(steps, n_outer)
    rows_pad = n_outer * n_inner * tile_r
    padded = rows_pad * _LANES

    x_flat = jnp.ravel(x)
    if padded != n:
        # padding with the dtype's lowest value makes any in-kernel tail mask
        # unnecessary (padded elements sit at larger flat indices).
        x_flat = jnp.pad(x_flat, (0, padded - n), constant_values=lowest)
    x2d = x_flat.reshape(rows_pad, _LANES)

    def kernel(x_ref, m_out, i_out, m_sc, r_sc):
        s = pl.program_id(1)

        @pl.when(s == 0)
        def _init():
            m_sc[...] = jnp.full(m_sc.shape, lowest, m_sc.dtype)
            r_sc[...] = jnp.zeros(r_sc.shape, jnp.int32)

        xb = x_ref[...]                                    # (tile_r, 128), native dtype
        m_lane = jnp.max(xb, axis=0, keepdims=True)        # (1, 128)
        rel = lax.broadcasted_iota(jnp.int32, xb.shape, 0)
        cand = jnp.where(xb == m_lane, rel, jnp.int32(tile_r))
        r_lane = jnp.min(cand, axis=0, keepdims=True)      # first hit (tile-rel)

        base = (pl.program_id(0) * n_inner + s) * tile_r
        better = m_lane > m_sc[...]                        # strict > keeps first
        r_sc[...] = jnp.where(better, r_lane + base, r_sc[...])
        m_sc[...] = jnp.where(better, m_lane, m_sc[...])

        @pl.when(s == pl.num_programs(1) - 1)
        def _fin():
            m_out[...] = jnp.broadcast_to(m_sc[...], m_out.shape)
            i_out[...] = jnp.broadcast_to(r_sc[...], i_out.shape)

    m_part, i_part = pl.pallas_call(
        kernel,
        out_shape=(
            jax.ShapeDtypeStruct((n_outer * _SUBLANES, _LANES), dtype),
            jax.ShapeDtypeStruct((n_outer * _SUBLANES, _LANES), jnp.int32),
        ),
        grid_spec=pltpu.PrefetchScalarGridSpec(
            num_scalar_prefetch=0,
            grid=(n_outer, n_inner),
            in_specs=[pl.BlockSpec((tile_r, _LANES),
                                   lambda o, s: (o * n_inner + s, 0))],
            out_specs=[
                pl.BlockSpec((_SUBLANES, _LANES), lambda o, s: (o, 0)),
                pl.BlockSpec((_SUBLANES, _LANES), lambda o, s: (o, 0)),
            ],
            scratch_shapes=[pltpu.VMEM((1, _LANES), dtype),
                            pltpu.VMEM((1, _LANES), jnp.int32)],
        ),
        compiler_params=pltpu.CompilerParams(
            dimension_semantics=("parallel", "arbitrary")),
    )(x2d)

    # Tiny cross-lane / cross-core combine (<= 2*8*128 values) in plain jnp.
    lane = lax.broadcasted_iota(jnp.int32, i_part.shape, 1)
    flat = i_part * _LANES + lane
    gmax = jnp.max(m_part)
    return jnp.min(jnp.where(m_part == gmax, flat, jnp.int32(_INT_SENTINEL)))


# ----------------------------------------------------------------------------
# dim=k (not the last axis): reduce over the middle axis of (pre, K, post)
# ----------------------------------------------------------------------------
def _argmax_mid(x: jax.Array, dim: int) -> jax.Array:
    shape = x.shape
    K = shape[dim]
    pre = math.prod(shape[:dim])
    post = math.prod(shape[dim + 1:])
    dtype = x.dtype
    item = dtype.itemsize
    lowest = _lowest_py(dtype)
    x3 = x.reshape(pre, K, post)

    plane_bytes = K * post * item
    if plane_bytes <= _BLOCK_BYTES:
        # whole (K, post) plane fits: pack several pre rows per block so the
        # ~0.35us per-grid-step overhead is amortized (NCHW channel argmax).
        tile_k, tile_post = K, post
        tile_pre = min(pre, max(1, _BLOCK_BYTES // max(plane_bytes, post * 4)))
    elif K * _LANES * item <= _BLOCK_BYTES:
        # full K, tile the lane (post) axis to a multiple of 128
        tile_k, tile_pre = K, 1
        cap = max(_LANES, (_BLOCK_BYTES // (K * item)) // _LANES * _LANES)
        tile_post = min(cap, _round_up(post, _LANES))
    else:
        # vocab-sized K: tile the reduction axis too (carried scratch)
        tile_pre = 1
        tile_post = post if post < _LANES else _LANES
        cap = max(_SUBLANES,
                  (_BLOCK_BYTES // (tile_post * item)) // _SUBLANES * _SUBLANES)
        tile_k = min(cap, _round_up(K, _SUBLANES))

    pre_pad = _round_up(pre, tile_pre)
    post_pad = _round_up(post, tile_post)
    K_pad = _round_up(K, tile_k)
    if (pre_pad, K_pad, post_pad) != (pre, K, post):
        x3 = jnp.pad(x3, ((0, pre_pad - pre), (0, K_pad - K),
                          (0, post_pad - post)), constant_values=lowest)

    grid = (pre_pad // tile_pre, post_pad // tile_post, K_pad // tile_k)

    def kernel(x_ref, o_ref, m_sc, i_sc):
        k = pl.program_id(2)

        @pl.when(k == 0)
        def _init():
            m_sc[...] = jnp.full(m_sc.shape, lowest, m_sc.dtype)
            i_sc[...] = jnp.zeros(i_sc.shape, jnp.int32)

        xb = x_ref[...]                                   # (tile_pre, tile_k, tile_post)
        m = jnp.max(xb, axis=1, keepdims=True)            # (tile_pre, 1, tile_post)
        ik = lax.broadcasted_iota(jnp.int32, xb.shape, 1)
        cand = jnp.where(xb == m, ik, jnp.int32(tile_k))
        idx = jnp.min(cand, axis=1, keepdims=True) + k * tile_k

        better = m > m_sc[...]                            # strict > keeps first
        i_sc[...] = jnp.where(better, idx, i_sc[...])
        m_sc[...] = jnp.where(better, m, m_sc[...])

        @pl.when(k == pl.num_programs(2) - 1)
        def _fin():
            o_ref[...] = i_sc[...]                        # lane-dense store

    out = pl.pallas_call(
        kernel,
        out_shape=jax.ShapeDtypeStruct((pre_pad, 1, post_pad), jnp.int32),
        grid_spec=pltpu.PrefetchScalarGridSpec(
            num_scalar_prefetch=0,
            grid=grid,
            in_specs=[pl.BlockSpec((tile_pre, tile_k, tile_post),
                                   lambda i, j, k: (i, k, j))],
            out_specs=pl.BlockSpec((tile_pre, 1, tile_post),
                                   lambda i, j, k: (i, 0, j)),
            scratch_shapes=[pltpu.VMEM((tile_pre, 1, tile_post), dtype),
                            pltpu.VMEM((tile_pre, 1, tile_post), jnp.int32)],
        ),
        compiler_params=pltpu.CompilerParams(
            dimension_semantics=("parallel", "parallel", "arbitrary")),
    )(x3)
    return out[:pre, 0, :post].reshape(shape[:dim] + shape[dim + 1:])


# ----------------------------------------------------------------------------
# dim = last axis (or all trailing dims are size 1): reduce over last axis
# ----------------------------------------------------------------------------
def _argmax_last(x: jax.Array, dim: int) -> jax.Array:
    shape = x.shape
    K = shape[dim]
    M = max(1, x.size // K)
    dtype = x.dtype
    item = dtype.itemsize
    lowest = _lowest_py(dtype)
    x2 = x.reshape(M, K)
    result_shape = shape[:dim] + shape[dim + 1:]

    col2row = _col_to_row_form()

    if col2row is not None and K * item * _LANES <= _BLOCK_BYTES:
        mode = "lane"        # single K chunk, lane-dense (1, 1, tile_m) output
        tile_k = K
        cap = max(_LANES, (_BLOCK_BYTES // (K * item)) // _LANES * _LANES)
        tile_m = min(8192, cap, _round_up(M, _LANES))
    elif K * item * _SUBLANES <= _BLOCK_BYTES:
        mode = "col"         # single K chunk, (tile_m, 1) output (fallback)
        tile_k = K
        cap = max(_SUBLANES,
                  (_BLOCK_BYTES // (K * item)) // _SUBLANES * _SUBLANES)
        tile_m = min(2048, cap, _round_up(M, _SUBLANES))
    else:
        mode = "col_tiled"   # vocab-sized K: K-tiled grid axis, carried scratch
        tile_m = _SUBLANES
        cap = max(_LANES,
                  (_BLOCK_BYTES // (tile_m * item)) // _LANES * _LANES)
        tile_k = min(cap, _round_up(K, _LANES))

    M_pad = _round_up(M, tile_m)
    K_pad = _round_up(K, tile_k)
    if (M_pad, K_pad) != (M, K):
        x2 = jnp.pad(x2, ((0, M_pad - M), (0, K_pad - K)),
                     constant_values=lowest)
    grid_m = M_pad // tile_m
    grid_k = K_pad // tile_k
    single_k = grid_k == 1

    def kernel(x_ref, o_ref, *scr):
        xb = x_ref[...]                                    # (tile_m, tile_k)
        m = jnp.max(xb, axis=1, keepdims=True)             # (tile_m, 1)
        ik = lax.broadcasted_iota(jnp.int32, xb.shape, 1)
        cand = jnp.where(xb == m, ik, jnp.int32(tile_k))
        idx = jnp.min(cand, axis=1, keepdims=True)         # first hit (chunk-rel)

        if single_k:
            if mode == "lane":
                o_ref[0] = col2row(idx)                    # lane-dense (1, tile_m)
            else:
                o_ref[...] = idx
        else:
            m_sc, i_sc = scr
            k = pl.program_id(1)

            @pl.when(k == 0)
            def _init():
                m_sc[...] = jnp.full(m_sc.shape, lowest, m_sc.dtype)
                i_sc[...] = jnp.zeros(i_sc.shape, jnp.int32)

            better = m > m_sc[...]                         # strict > keeps first
            i_sc[...] = jnp.where(better, idx + k * tile_k, i_sc[...])
            m_sc[...] = jnp.where(better, m, m_sc[...])

            @pl.when(k == pl.num_programs(1) - 1)
            def _fin():
                o_ref[...] = i_sc[...]

    if mode == "lane":
        out_sds = jax.ShapeDtypeStruct((grid_m, 1, tile_m), jnp.int32)
        out_spec = pl.BlockSpec((1, 1, tile_m), lambda i, k: (i, 0, 0))
    else:
        out_sds = jax.ShapeDtypeStruct((M_pad, 1), jnp.int32)
        out_spec = pl.BlockSpec((tile_m, 1), lambda i, k: (i, 0))

    scratch = [] if single_k else [pltpu.VMEM((tile_m, 1), dtype),
                                   pltpu.VMEM((tile_m, 1), jnp.int32)]

    out = pl.pallas_call(
        kernel,
        out_shape=out_sds,
        grid_spec=pltpu.PrefetchScalarGridSpec(
            num_scalar_prefetch=0,
            grid=(grid_m, grid_k),
            in_specs=[pl.BlockSpec((tile_m, tile_k), lambda i, k: (i, k))],
            out_specs=out_spec,
            scratch_shapes=scratch,
        ),
        compiler_params=pltpu.CompilerParams(
            dimension_semantics=("parallel", "arbitrary")),
    )(x2)

    return out.reshape(M_pad)[:M].reshape(result_shape)


def argmax_pallas(x: jax.Array, dim=None) -> jax.Array:
    """Equivalent of torch.argmax(x, dim) with int32 indices."""
    if dim is None:
        return _argmax_flat(x)
    d = dim % x.ndim
    post = math.prod(x.shape[d + 1:])
    if d == x.ndim - 1 or post == 1:
        return _argmax_last(x, d)
    return _argmax_mid(x, d)


class ArgMax:
    """JAX/Pallas equivalent of the PyTorch ArgMax module."""

    def __init__(self, dim=None):
        self.dim = dim

    def __call__(self, x: jax.Array) -> jax.Array:
        return argmax_pallas(x, dim=self.dim)


if __name__ == "__main__":
    key = jax.random.PRNGKey(0)
    k0, k1 = jax.random.split(key)
    # NCHW input, matching PyTorch conv-style tensors
    x = jax.random.normal(k0, (2, 4, 16, 16), dtype=jnp.float32)

    # dim=None : global argmax over the flattened tensor
    out_none = jax.block_until_ready(ArgMax(dim=None)(x))
    ref_none = jnp.argmax(x)
    assert out_none.shape == ()
    assert int(out_none) == int(ref_none)

    # dim=1 : channel argmax (middle-axis path, (tile_pre, K, post) blocks)
    out_c = jax.block_until_ready(ArgMax(dim=1)(x))
    ref_c = jnp.argmax(x, axis=1)
    assert out_c.shape == ref_c.shape
    assert bool(jnp.all(out_c == ref_c))

    # dim=-1 : last-axis argmax (lane-dense output path)
    out_w = jax.block_until_ready(ArgMax(dim=-1)(x))
    ref_w = jnp.argmax(x, axis=-1)
    assert out_w.shape == ref_w.shape
    assert bool(jnp.all(out_w == ref_w))

    # unaligned extents: exercises the pad-to-tile path
    y = jax.random.normal(k1, (5, 37), dtype=jnp.float32)
    out_y = jax.block_until_ready(ArgMax(dim=-1)(y))
    assert bool(jnp.all(out_y == jnp.argmax(y, axis=-1)))

    # bf16 input: comparisons run in the native dtype (no f32 upcast)
    xb16 = x.astype(jnp.bfloat16)
    out_b = jax.block_until_ready(ArgMax(dim=-1)(xb16))
    assert bool(jnp.all(out_b == jnp.argmax(xb16, axis=-1)))

    print("KERNEL_OK")
</pallas_src>

<mosaic_0001>
module attributes {stable_mosaic.version = 11 : i64} {
  func.func @kernel(%arg0: i32, %arg1: i32, %arg2: memref<16x128xf32, #tpu.memory_space<vmem>>, %arg3: memref<8x128xf32, #tpu.memory_space<vmem>>, %arg4: memref<8x128xi32, #tpu.memory_space<vmem>>, %arg5: memref<1x128xf32, #tpu.memory_space<vmem>>, %arg6: memref<1x128xi32, #tpu.memory_space<vmem>>) attributes {dimension_semantics = [#tpu.dimension_semantics<parallel>, #tpu.dimension_semantics<arbitrary>], iteration_bounds = array<i64: 1, 1>, scalar_prefetch = 0 : i64, scratch_operands = 2 : i64, tpu.core_type = #tpu.core_type<tc>, window_params = [{transform_indices = @transform_0, window_bounds = array<i64: 16, 128>}, {transform_indices = @transform_1, window_bounds = array<i64: 8, 128>}, {transform_indices = @transform_2, window_bounds = array<i64: 8, 128>}]} {
    %c0_i32 = arith.constant 0 : i32
    %0 = arith.cmpi eq, %arg1, %c0_i32 : i32
    %1 = arith.extui %0 : i1 to i32
    %c0_i32_0 = arith.constant 0 : i32
    %2 = arith.cmpi ne, %1, %c0_i32_0 : i32
    scf.if %2 {
      %cst_16 = arith.constant 0xFF800000 : f32
      %29 = vector.broadcast %cst_16 : f32 to vector<1x128xf32>
      %c0_17 = arith.constant 0 : index
      %c0_18 = arith.constant 0 : index
      %30 = vector.load %arg5[%c0_17, %c0_18] : memref<1x128xf32, #tpu.memory_space<vmem>>, vector<1x128xf32>
      tpu.vector_store %arg5[%c0_17, %c0_18], %29 {strides = array<i32>} : memref<1x128xf32, #tpu.memory_space<vmem>>, vector<1x128xf32>,
      %c0_i32_19 = arith.constant 0 : i32
      %31 = vector.broadcast %c0_i32_19 : i32 to vector<1x128xi32>
      %c0_20 = arith.constant 0 : index
      %c0_21 = arith.constant 0 : index
      %32 = vector.load %arg6[%c0_20, %c0_21] : memref<1x128xi32, #tpu.memory_space<vmem>>, vector<1x128xi32>
      tpu.vector_store %arg6[%c0_20, %c0_21], %31 {strides = array<i32>} : memref<1x128xi32, #tpu.memory_space<vmem>>, vector<1x128xi32>,
    } else {
    }
    %c0 = arith.constant 0 : index
    %c0_1 = arith.constant 0 : index
    %3 = vector.load %arg2[%c0, %c0_1] : memref<16x128xf32, #tpu.memory_space<vmem>>, vector<16x128xf32>
    %cst = arith.constant dense<0xFF800000> : vector<128xf32>
    %4 = vector.multi_reduction <maximumf>, %3, %cst [0] : vector<16x128xf32> to vector<128xf32>
    %5 = vector.shape_cast %4 : vector<128xf32> to vector<1x128xf32>
    %6 = tpu.iota {dimensions = array<i32: 0>} : vector<16x128xi32>
    %7 = vector.broadcast %5 : vector<1x128xf32> to vector<16x128xf32>
    %8 = arith.cmpf oeq, %3, %7 : vector<16x128xf32>
    %c16_i32 = arith.constant 16 : i32
    %9 = vector.broadcast %c16_i32 : i32 to vector<16x128xi32>
    %10 = arith.select %8, %6, %9 : vector<16x128xi1>, vector<16x128xi32>
    %cst_2 = arith.constant dense<2147483647> : vector<128xi32>
    %11 = vector.multi_reduction <minsi>, %10, %cst_2 [0] : vector<16x128xi32> to vector<128xi32>
    %12 = vector.shape_cast %11 : vector<128xi32> to vector<1x128xi32>
    %c1_i32 = arith.constant 1 : i32
    %13 = arith.muli %arg0, %c1_i32 : i32
    %14 = arith.addi %13, %arg1 : i32
    %c16_i32_3 = arith.constant 16 : i32
    %15 = arith.muli %14, %c16_i32_3 : i32
    %c0_4 = arith.constant 0 : index
    %c0_5 = arith.constant 0 : index
    %16 = vector.load %arg5[%c0_4, %c0_5] : memref<1x128xf32, #tpu.memory_space<vmem>>, vector<1x128xf32>
    %17 = arith.cmpf ogt, %5, %16 : vector<1x128xf32>
    %18 = vector.broadcast %15 : i32 to vector<1x128xi32>
    %19 = arith.addi %12, %18 : vector<1x128xi32>
    %c0_6 = arith.constant 0 : index
    %c0_7 = arith.constant 0 : index
    %20 = vector.load %arg6[%c0_6, %c0_7] : memref<1x128xi32, #tpu.memory_space<vmem>>, vector<1x128xi32>
    %21 = arith.select %17, %19, %20 : vector<1x128xi1>, vector<1x128xi32>
    %c0_8 = arith.constant 0 : index
    %c0_9 = arith.constant 0 : index
    %22 = vector.load %arg6[%c0_8, %c0_9] : memref<1x128xi32, #tpu.memory_space<vmem>>, vector<1x128xi32>
    tpu.vector_store %arg6[%c0_8, %c0_9], %21 {strides = array<i32>} : memref<1x128xi32, #tpu.memory_space<vmem>>, vector<1x128xi32>,
    %c0_10 = arith.constant 0 : index
    %c0_11 = arith.constant 0 : index
    %23 = vector.load %arg5[%c0_10, %c0_11] : memref<1x128xf32, #tpu.memory_space<vmem>>, vector<1x128xf32>
    %24 = arith.select %17, %5, %23 : vector<1x128xi1>, vector<1x128xf32>
    %c0_12 = arith.constant 0 : index
    %c0_13 = arith.constant 0 : index
    %25 = vector.load %arg5[%c0_12, %c0_13] : memref<1x128xf32, #tpu.memory_space<vmem>>, vector<1x128xf32>
    tpu.vector_store %arg5[%c0_12, %c0_13], %24 {strides = array<i32>} : memref<1x128xf32, #tpu.memory_space<vmem>>, vector<1x128xf32>,
    %c0_i32_14 = arith.constant 0 : i32
    %26 = arith.cmpi eq, %arg1, %c0_i32_14 : i32
    %27 = arith.extui %26 : i1 to i32
    %c0_i32_15 = arith.constant 0 : i32
    %28 = arith.cmpi ne, %27, %c0_i32_15 : i32
    scf.if %28 {
      %c0_16 = arith.constant 0 : index
      %c0_17 = arith.constant 0 : index
      %29 = vector.load %arg5[%c0_16, %c0_17] : memref<1x128xf32, #tpu.memory_space<vmem>>, vector<1x128xf32>
      %30 = vector.shape_cast %29 : vector<1x128xf32> to vector<1x128xf32>
      %31 = vector.broadcast %30 : vector<1x128xf32> to vector<8x128xf32>
      %c0_18 = arith.constant 0 : index
      %c0_19 = arith.constant 0 : index
      %32 = vector.load %arg3[%c0_18, %c0_19] : memref<8x128xf32, #tpu.memory_space<vmem>>, vector<8x128xf32>
      tpu.vector_store %arg3[%c0_18, %c0_19], %31 {strides = array<i32>} : memref<8x128xf32, #tpu.memory_space<vmem>>, vector<8x128xf32>,
      %c0_20 = arith.constant 0 : index
      %c0_21 = arith.constant 0 : index
      %33 = vector.load %arg6[%c0_20, %c0_21] : memref<1x128xi32, #tpu.memory_space<vmem>>, vector<1x128xi32>
      %34 = vector.shape_cast %33 : vector<1x128xi32> to vector<1x128xi32>
      %35 = vector.broadcast %34 : vector<1x128xi32> to vector<8x128xi32>
      %c0_22 = arith.constant 0 : index
      %c0_23 = arith.constant 0 : index
      %36 = vector.load %arg4[%c0_22, %c0_23] : memref<8x128xi32, #tpu.memory_space<vmem>>, vector<8x128xi32>
      tpu.vector_store %arg4[%c0_22, %c0_23], %35 {strides = array<i32>} : memref<8x128xi32, #tpu.memory_space<vmem>>, vector<8x128xi32>,
    } else {
    }
    return
  }
  func.func @transform_0(%arg0: i32, %arg1: i32) -> (i32, i32) {
    %c1_i32 = arith.constant 1 : i32
    %0 = arith.muli %arg0, %c1_i32 : i32
    %1 = arith.addi %0, %arg1 : i32
    %c0_i32 = arith.constant 0 : i32
    %c0_i32_0 = arith.constant 0 : i32
    return %1, %c0_i32 : i32, i32
  }
  func.func @transform_1(%arg0: i32, %arg1: i32) -> (i32, i32) {
    %c0_i32 = arith.constant 0 : i32
    %c0_i32_0 = arith.constant 0 : i32
    return %arg0, %c0_i32 : i32, i32
  }
  func.func @transform_2(%arg0: i32, %arg1: i32) -> (i32, i32) {
    %c0_i32 = arith.constant 0 : i32
    %c0_i32_0 = arith.constant 0 : i32
    return %arg0, %c0_i32 : i32, i32
  }
}

</mosaic_0001>

<bundles_post_ra>
// kernel: tpu_custom_call.1
= control target key start
LH: loop header
LB: loop body
LE: loop exit
PB: predicated region body
PF: predicated region fallthrough
CT: control target
= control target key end

     0   :  { %8 = vsyncpa [#allocation5], 0  ;;  %s243_s0 = inlined_call_operand.hbm [shape: f32[16,128], index: 0, kind: input, shape index: {}]   ;;  %s244_s1 = inlined_call_operand.hbm [shape: f32[8,128], index: 1, kind: output, shape index: {0}]   ;;  %s245_s2 = inlined_call_operand.hbm [shape: s32[8,128], index: 2, kind: output, shape index: {1}]  }
   0x1   :  { %9 = vsyncpa [#allocation6], 0 }
   0x2   :  { %10 = vsyncpa [#allocation9], 0  ;;  %s19_s11 = sshll.u32 %s243_s0, 4  ;;  %s210_s12 = smov [#allocation4]   ;;  %s20_s11 = int_to_ptr.hbm [resolvable:$true] %s19_s11 }
   0x3   :  { %s21_s13 = sshll.u32 %s210_s12, 4  ;;  %s211_s14 = smov 128   ;;  %s22_s13 = int_to_ptr.vmem [resolvable:$true] %s21_s13 }
   0x4   :  { %s212_s15 = smov 8  }
   0x5   :  { %27 = dma.hbm_to_vmem [thread:$0]  %s20_s11, 256, %s22_s13, [#allocation5], %s211_s14, %s211_s14, %s212_s15  }
   0x6   :  { %204 = dma.done.wait [#allocation5], 256  }
   0x7   :  { %205 = vsyncadd [#allocation5], 4294967040  ;;  %v213_v0 = vmov -inf   ;;  %v214_v1 = vmov 0   ;;  %v40_v2 = vld [vmem:[#allocation4] sm:$0xff]  ;;  %v41_v3 = vld [vmem:[#allocation4 + $0x8] sm:$0xff]  ;;  %v49_v6 = vlaneseq }
   0x8   :  { %38 = vst [vmem:[#allocation2] sm:$0x1] %v213_v0  ;;  %v42_v4 = vmax.f32 %v40_v2, %v41_v3  ;;  %s215_s0 = smov [#allocation7]   ;;  %s97_s19 = sshll.u32 %s244_s1, 4  ;;  %s98_s19 = int_to_ptr.hbm [resolvable:$true] %s97_s19 }
   0x9   :  { %39 = vst [vmem:[#allocation3] sm:$0x1] %v214_v1  ;;  %v50_v9 = vshrl.u32 %v49_v6, 7  ;;  %s95_s16 = sshll.u32 %s215_s0, 4  ;;  %s216_s20 = smov [#allocation8]   ;;  %s96_s16 = int_to_ptr.vmem [resolvable:$true] %s95_s16 }
   0xa   :  { %v43_v5 = vrot.slane %v42_v4, 4  ;;  %s106_s21 = sshll.u32 %s216_s20, 4  ;;  %s108_s23 = sshll.u32 %s245_s2, 4  ;;  %s107_s21 = int_to_ptr.vmem [resolvable:$true] %s106_s21  ;;  %s109_s23 = int_to_ptr.hbm [resolvable:$true] %s108_s23 }
   0xb   :  { %v51_v13 = vadd.s32 8, %v50_v9 }
   0xc   :  { %v44_v7 = vmax.f32 %v42_v4, %v43_v5 }
   0xe   :  { %v45_v8 = vrot.slane %v44_v7, 2 }
   0xf   :  { %v69_v12 = vld [vmem:[#allocation2] sm:$0x1] }
  0x10   :  { %v46_v10 = vmax.f32 %v44_v7, %v45_v8  ;;  %v76_v15 = vld [vmem:[#allocation2] sm:$0x1]  ;;  %v73_v26 = vld [vmem:[#allocation3] sm:$0x1] }
  0x12   :  { %v47_v11 = vrot.slane %v46_v10, 1 }
  0x14   :  { %v48_v14 = vmax.f32 %v46_v10, %v47_v11 }
  0x16   :  { %vm70_vm0 = vcmp.gt.f32.partialorder %v48_v14, %v69_v12  ;;  %vm52_vm1 = vcmp.eq.f32.partialorder %v40_v2, %v48_v14  ;;  %vm53_vm2 = vcmp.eq.f32.partialorder %v41_v3, %v48_v14 }
  0x17   :  { %v77_v16 = vsel %vm70_vm0, %v48_v14, %v76_v15  ;;  %v54_v17 = vsel %vm52_vm1, %v50_v9, 16  ;;  %v55_v18 = vsel %vm53_vm2, %v51_v13, 16 }
  0x18   :  { %78 = vst [vmem:[#allocation2] sm:$0x1] %v77_v16  ;;  %vm56_vm3 = vcmp.lt.s32.totalorder %v54_v17, %v55_v18 }
  0x19   :  { %v57_v19 = vsel %vm56_vm3, %v54_v17, %v55_v18 }
  0x1a   :  { %v58_v20 = vrot.slane %v57_v19, 4 }
  0x1c   :  { %vm59_vm4 = vcmp.lt.s32.totalorder %v57_v19, %v58_v20 }
  0x1d   :  { %v60_v21 = vsel %vm59_vm4, %v57_v19, %v58_v20 }
  0x1e   :  { %v61_v22 = vrot.slane %v60_v21, 2 }
  0x1f   :  { %v130_v23 = vld [vmem:[#allocation2] ss:$0 sm:$0xff] }
  0x20   :  { %vm62_vm5 = vcmp.lt.s32.totalorder %v60_v21, %v61_v22  ;;  %86 = vst [vmem:[#allocation7] sm:$0xff] %v130_v23 }
  0x21   :  { %v63_v24 = vsel %vm62_vm5, %v60_v21, %v61_v22  ;;  %100 = dma.vmem_to_hbm [thread:$0]  %s96_s16, 128, %s98_s19, [#allocation6]  }
  0x22   :  { %v64_v25 = vrot.slane %v63_v24, 1 }
  0x24   :  { %vm65_vm6 = vcmp.lt.s32.totalorder %v63_v24, %v64_v25 }
  0x25   :  { %v66_v27 = vsel %vm65_vm6, %v63_v24, %v64_v25 }
  0x26   :  { %v74_v28 = vsel %vm70_vm0, %v66_v27, %v73_v26 }
  0x27   :  { %75 = vst [vmem:[#allocation3] sm:$0x1] %v74_v28 }
  0x2e   :  { %v131_v29 = vld [vmem:[#allocation3] ss:$0 sm:$0xff] }
  0x2f   :  { %89 = vst [vmem:[#allocation8] sm:$0xff] %v131_v29 }
  0x30   :  { %111 = dma.vmem_to_hbm [thread:$0]  %s107_s21, 128, %s109_s23, [#allocation9]  }
  0x31   :  { %206 = dma.done.wait [#allocation6], 128  }
  0x32   :  { %207 = vsyncadd [#allocation6], 4294967168 }
  0x33   :  { %208 = dma.done.wait [#allocation9], 128  }
  0x34   :  { %209 = vsyncadd [#allocation9], 4294967168 }
  0x35   :  { %120 = vsyncpa [#allocation5], 1 }
  0x36   :  { %121 = vsyncpa [#allocation6], 1 }
  0x37   :  { %122 = vsyncpa [#allocation9], 1 }

</bundles_post_ra>
